<compile_context>
chip_gen: v7x
topology: tpu7x:2x2x1
jax: 0.10.0
libtpu: 0.0.40
codegen_flags: <defaults>
</compile_context>

<pallas_src>
import math

import jax
import jax.numpy as jnp
from jax.experimental import pallas as pl
from jax.experimental.pallas import tpu as pltpu

# --- deterministic "hyperparameters" (mirrors OutputNeuron.__init__) ---
TAU = 10.0
BETA = math.exp(-1.0 / TAU)
FACTOR = (1.0 - BETA ** 2) ** 0.5       # params['1-beta'] == 'improved'

_LANE = 128                  # lane-dense last dim (multiple of 128 -> unmasked vst)
_MAX_BLOCK_ROWS = 2048       # (2048, 128) f32 block = 1 MiB/buffer; forward uses
                             # 3 arrays x 2 buffers ~ 6 MiB, scan ~ 9 MiB -> safe
                             # well under the 32 MiB scoped limit on v5e/v6e/v7x.
_VMEM_LIMIT = 32 * 1024 * 1024
_PALLAS_MIN_ELEMS = 64 * 1024   # below this a fused XLA elementwise op wins
                                # (~0.35 us per grid step of launch/DMA overhead).


def _round_up(x, m):
    return (x + m - 1) // m * m


def _min_sublane(dtype):
    """Dtype-aware min sublane tile: f32 -> 8, bf16/f16 -> 16, int8/fp8 -> 32."""
    return max(8, 32 // jnp.dtype(dtype).itemsize)


def _row_geometry(total, dtype):
    """Row geometry for a flat array of `total` elems viewed as [rows, 128].

    rows is only padded up to the dtype's min sublane tile (NOT to a block
    multiple); the final grid block may be ragged and Pallas masks it.
    block_rows is chosen so the parallel axis has >=2 blocks whenever possible
    (keeps both v7x TensorCores busy on this HBM-bandwidth-bound kernel).
    """
    sub = _min_sublane(dtype)
    rows = _round_up(pl.cdiv(total, _LANE), sub)
    if rows >= 2 * sub:
        block_rows = min(_MAX_BLOCK_ROWS, _round_up(pl.cdiv(rows, 2), sub))
    else:
        block_rows = rows
    grid_rows = pl.cdiv(rows, block_rows)
    return rows, block_rows, grid_rows


def _to_lanes(flat, rows):
    """View a flat [..., total] array as lane-dense [..., rows, 128].

    When total == rows*128 this is a pure (layout-preserving) reshape — no copy,
    no pad, no post-kernel slice. Otherwise the pad is at most one sublane tile
    (< 4K elements), never a round-up to a block multiple.
    """
    pad = rows * _LANE - flat.shape[-1]
    if pad:
        flat = jnp.pad(flat, [(0, 0)] * (flat.ndim - 1) + [(0, pad)])
    return flat.reshape(flat.shape[:-1] + (rows, _LANE))


# ---------------------------------------------------------------------------
# Kernel 1: single timestep (exactly OutputNeuron.forward)
# ---------------------------------------------------------------------------
def _output_neuron_kernel(x_ref, mem_ref, new_mem_ref):
    """Elementwise leaky integration on the VPU: new_mem = beta*mem + factor*x.

    Compute stays f32 even if inputs are bf16 (v5e has no bf16 VPU path and the
    recurrent state should not be accumulated in bf16).
    """
    new_mem_ref[...] = (
        BETA * mem_ref[...].astype(jnp.float32)
        + FACTOR * x_ref[...].astype(jnp.float32)
    ).astype(new_mem_ref.dtype)


def output_neuron_forward(x, mem, *, use_pallas=None):
    """One OutputNeuron step. x, mem: [B, N]. Returns (new_mem, {'mem': new_mem})."""
    assert x.shape == mem.shape and x.dtype == mem.dtype
    orig_shape = x.shape
    total = x.size
    if use_pallas is None:
        use_pallas = total >= _PALLAS_MIN_ELEMS
    if not use_pallas:
        # Tiny-shape fast path: fused XLA elementwise beats any pallas_call here.
        new_mem = (BETA * mem.astype(jnp.float32)
                   + FACTOR * x.astype(jnp.float32)).astype(x.dtype)
        return new_mem, {"mem": new_mem}

    rows, block_rows, grid_rows = _row_geometry(total, x.dtype)
    x2 = _to_lanes(x.reshape(-1), rows)
    m2 = _to_lanes(mem.reshape(-1), rows)
    itemsize = jnp.dtype(x.dtype).itemsize

    new_mem2 = pl.pallas_call(
        _output_neuron_kernel,
        out_shape=jax.ShapeDtypeStruct((rows, _LANE), x.dtype),
        grid_spec=pltpu.PrefetchScalarGridSpec(
            num_scalar_prefetch=0,
            grid=(grid_rows,),
            in_specs=[
                pl.BlockSpec((block_rows, _LANE), lambda i: (i, 0)),
                pl.BlockSpec((block_rows, _LANE), lambda i: (i, 0)),
            ],
            out_specs=pl.BlockSpec((block_rows, _LANE), lambda i: (i, 0)),
        ),
        compiler_params=pltpu.CompilerParams(
            dimension_semantics=("parallel",),   # shard row tiles across TCs (v7x)
            vmem_limit_bytes=_VMEM_LIMIT,
        ),
        input_output_aliases={1: 0},             # donate mem buffer -> new_mem
        cost_estimate=pl.CostEstimate(
            flops=2 * rows * _LANE,
            transcendentals=0,
            bytes_accessed=3 * rows * _LANE * itemsize,
        ),
    )(x2, m2)

    if rows * _LANE != total:
        new_mem = new_mem2.reshape(-1)[:total].reshape(orig_shape)
    else:
        new_mem = new_mem2.reshape(orig_shape)   # free reshape, no slice copy
    return new_mem, {"mem": new_mem}


# ---------------------------------------------------------------------------
# Kernel 2: fused time loop — mem stays resident on-chip across T steps
# ---------------------------------------------------------------------------
def _output_neuron_scan_kernel_f32(x_ref, mem0_ref, out_ref, memT_ref):
    """f32 path: the membrane state is carried directly in the memT output block,
    which is resident in VMEM across the (innermost) time axis."""
    t = pl.program_id(1)

    @pl.when(t == 0)
    def _():
        memT_ref[...] = mem0_ref[...]

    new_mem = BETA * memT_ref[...] + FACTOR * x_ref[0]
    memT_ref[...] = new_mem
    out_ref[0] = new_mem


def _output_neuron_scan_kernel_acc(x_ref, mem0_ref, out_ref, memT_ref, mem_sc):
    """Sub-f32 dtypes: carry the state in an f32 VMEM scratch to avoid per-step
    rounding drift; cast only the streamed outputs."""
    t = pl.program_id(1)

    @pl.when(t == 0)
    def _():
        mem_sc[...] = mem0_ref[...].astype(jnp.float32)

    new_mem = BETA * mem_sc[...] + FACTOR * x_ref[0].astype(jnp.float32)
    mem_sc[...] = new_mem
    out_ref[0] = new_mem.astype(out_ref.dtype)

    @pl.when(t == pl.num_programs(1) - 1)
    def _():
        memT_ref[...] = new_mem.astype(memT_ref.dtype)


def output_neuron_scan(xs, mem0, *, use_pallas=None):
    """Fused time loop: xs [T, B, N], mem0 [B, N] -> (outs [T, B, N], {'mem': mem_T})."""
    T, B, N = xs.shape
    assert mem0.shape == (B, N) and xs.dtype == mem0.dtype
    total = B * N
    if use_pallas is None:
        use_pallas = total >= _PALLAS_MIN_ELEMS
    if not use_pallas:
        return output_neuron_scan_reference(xs, mem0)

    rows, block_rows, grid_rows = _row_geometry(total, xs.dtype)
    xs3 = _to_lanes(xs.reshape(T, total), rows)
    m2 = _to_lanes(mem0.reshape(total), rows)
    itemsize = jnp.dtype(xs.dtype).itemsize

    is_f32 = jnp.dtype(xs.dtype) == jnp.dtype(jnp.float32)
    kernel = _output_neuron_scan_kernel_f32 if is_f32 else _output_neuron_scan_kernel_acc
    scratch = [] if is_f32 else [pltpu.VMEM((block_rows, _LANE), jnp.float32)]

    outs3, memT2 = pl.pallas_call(
        kernel,
        out_shape=(
            jax.ShapeDtypeStruct((T, rows, _LANE), xs.dtype),
            jax.ShapeDtypeStruct((rows, _LANE), xs.dtype),
        ),
        grid_spec=pltpu.PrefetchScalarGridSpec(
            num_scalar_prefetch=0,
            grid=(grid_rows, T),                 # time axis innermost (carried state)
            in_specs=[
                pl.BlockSpec((1, block_rows, _LANE), lambda r, t: (t, r, 0)),
                pl.BlockSpec((block_rows, _LANE), lambda r, t: (r, 0)),
            ],
            out_specs=[
                pl.BlockSpec((1, block_rows, _LANE), lambda r, t: (t, r, 0)),
                pl.BlockSpec((block_rows, _LANE), lambda r, t: (r, 0)),
            ],
            scratch_shapes=scratch,
        ),
        compiler_params=pltpu.CompilerParams(
            dimension_semantics=("parallel", "arbitrary"),
            vmem_limit_bytes=_VMEM_LIMIT,
        ),
        cost_estimate=pl.CostEstimate(
            flops=2 * T * rows * _LANE,
            transcendentals=0,
            bytes_accessed=(2 * T + 2) * rows * _LANE * itemsize,
        ),
    )(xs3, m2)

    if rows * _LANE != total:
        outs = outs3.reshape(T, rows * _LANE)[:, :total].reshape(T, B, N)
        memT = memT2.reshape(-1)[:total].reshape(B, N)
    else:
        outs = outs3.reshape(T, B, N)            # free reshapes, no slice copies
        memT = memT2.reshape(B, N)
    return outs, {"mem": memT}


# ---------------------------------------------------------------------------
# Pure-JAX references
# ---------------------------------------------------------------------------
def output_neuron_reference(x, mem):
    new_mem = BETA * mem + FACTOR * x
    return new_mem, {"mem": new_mem}


def output_neuron_scan_reference(xs, mem0):
    def step(mem, x):
        new_mem = BETA * mem + FACTOR * x
        return new_mem, new_mem

    memT, outs = jax.lax.scan(step, mem0, xs)
    return outs, {"mem": memT}


def _scan_reference_f32_state(xs, mem0):
    """Reference matching the kernel's f32-carried state for sub-f32 dtypes."""
    def step(mem, x):
        new_mem = BETA * mem + FACTOR * x.astype(jnp.float32)
        return new_mem, new_mem.astype(xs.dtype)

    memT, outs = jax.lax.scan(step, mem0.astype(jnp.float32), xs)
    return outs, {"mem": memT.astype(xs.dtype)}


if __name__ == "__main__":
    key = jax.random.PRNGKey(0)
    k1, k2, k3, k4, k5, k6, k7, k8 = jax.random.split(key, 8)

    # --- single-step, small module-natural shape [batch, size] ---
    batch, size = 2, 32
    x = jax.random.normal(k1, (batch, size), dtype=jnp.float32)
    initial_mem_param = jnp.zeros((size,), dtype=jnp.float32)   # nn.Parameter zeros
    mem0 = jnp.broadcast_to(initial_mem_param, (batch, size))
    prev_x = jax.random.normal(k2, (batch, size), dtype=jnp.float32)
    mem = BETA * mem0 + FACTOR * prev_x                          # non-trivial state

    ref_out, ref_h = output_neuron_reference(x, mem)
    # forced Pallas path (exercise the kernel even at tiny shape)
    out, new_h = output_neuron_forward(x, mem, use_pallas=True)
    out = jax.block_until_ready(out)
    assert out.shape == (batch, size)
    assert jnp.allclose(out, ref_out, atol=1e-6, rtol=1e-6)
    assert jnp.allclose(new_h["mem"], ref_h["mem"], atol=1e-6, rtol=1e-6)
    # auto path (tiny shape -> fused XLA fallback)
    out_a, _ = output_neuron_forward(x, mem)
    assert jnp.allclose(jax.block_until_ready(out_a), ref_out, atol=1e-6, rtol=1e-6)

    # --- single-step, multi-tile aligned shape (no pad / no slice, 2 parallel blocks) ---
    B2, N2 = 128, 2048
    xb = jax.random.normal(k3, (B2, N2), dtype=jnp.float32)
    mb = jax.random.normal(k4, (B2, N2), dtype=jnp.float32)
    outb, _ = output_neuron_forward(xb, mb)
    outb = jax.block_until_ready(outb)
    refb, _ = output_neuron_reference(xb, mb)
    assert jnp.allclose(outb, refb, atol=1e-6, rtol=1e-6)

    # --- single-step, ragged final block (rows not a multiple of block_rows) ---
    xr = jax.random.normal(k5, (12, 256), dtype=jnp.float32)
    mr = jax.random.normal(k6, (12, 256), dtype=jnp.float32)
    outr, _ = output_neuron_forward(xr, mr, use_pallas=True)
    outr = jax.block_until_ready(outr)
    refr, _ = output_neuron_reference(xr, mr)
    assert jnp.allclose(outr, refr, atol=1e-6, rtol=1e-6)

    # --- single-step, bf16 (dtype-aware 16-row sublane alignment) ---
    xh = jax.random.normal(k3, (16, 256), dtype=jnp.bfloat16)
    mh = jax.random.normal(k4, (16, 256), dtype=jnp.bfloat16)
    outh, _ = output_neuron_forward(xh, mh, use_pallas=True)
    outh = jax.block_until_ready(outh)
    refh, _ = output_neuron_reference(xh, mh)
    assert jnp.allclose(outh.astype(jnp.float32), refh.astype(jnp.float32),
                        atol=2e-2, rtol=2e-2)

    # --- fused time loop, small shape (f32 state-in-output kernel) ---
    T = 8
    xs = jax.random.normal(k7, (T, batch, size), dtype=jnp.float32)
    outs, hT = output_neuron_scan(xs, mem, use_pallas=True)
    outs = jax.block_until_ready(outs)
    ref_outs, ref_hT = output_neuron_scan_reference(xs, mem)
    assert jnp.allclose(outs, ref_outs, atol=1e-5, rtol=1e-5)
    assert jnp.allclose(hT["mem"], ref_hT["mem"], atol=1e-5, rtol=1e-5)

    # --- fused time loop, multi-row-tile aligned shape (mem resident per row tile) ---
    T2 = 3
    xs2 = jax.random.normal(k8, (T2, B2, N2), dtype=jnp.float32)
    outs2, hT2 = output_neuron_scan(xs2, mb)
    outs2 = jax.block_until_ready(outs2)
    ref_outs2, ref_hT2 = output_neuron_scan_reference(xs2, mb)
    assert jnp.allclose(outs2, ref_outs2, atol=1e-5, rtol=1e-5)
    assert jnp.allclose(hT2["mem"], ref_hT2["mem"], atol=1e-5, rtol=1e-5)

    # --- fused time loop, bf16 (f32 scratch-state kernel) ---
    T3 = 4
    xs3 = jax.random.normal(k7, (T3, 16, 256), dtype=jnp.bfloat16)
    outs3, hT3 = output_neuron_scan(xs3, mh, use_pallas=True)
    outs3 = jax.block_until_ready(outs3)
    ref_outs3, ref_hT3 = _scan_reference_f32_state(xs3, mh)
    assert jnp.allclose(outs3.astype(jnp.float32), ref_outs3.astype(jnp.float32),
                        atol=2e-2, rtol=2e-2)
    assert jnp.allclose(hT3["mem"].astype(jnp.float32),
                        ref_hT3["mem"].astype(jnp.float32), atol=2e-2, rtol=2e-2)

    print("KERNEL_OK")
</pallas_src>

<mosaic_0001>
module attributes {stable_mosaic.version = 11 : i64} {
  func.func @_output_neuron_kernel(%arg0: i32, %arg1: memref<8x128xf32, #tpu.memory_space<vmem>>, %arg2: memref<8x128xf32, #tpu.memory_space<vmem>>, %arg3: memref<8x128xf32, #tpu.memory_space<vmem>>) attributes {dimension_semantics = [#tpu.dimension_semantics<parallel>], iteration_bounds = array<i64: 1>, scalar_prefetch = 0 : i64, scratch_operands = 0 : i64, tpu.core_type = #tpu.core_type<tc>, window_params = [{transform_indices = @transform_0, window_bounds = array<i64: 8, 128>}, {transform_indices = @transform_1, window_bounds = array<i64: 8, 128>}, {transform_indices = @transform_2, window_bounds = array<i64: 8, 128>}]} {
    %c0 = arith.constant 0 : index
    %c0_0 = arith.constant 0 : index
    %0 = vector.load %arg2[%c0, %c0_0] : memref<8x128xf32, #tpu.memory_space<vmem>>, vector<8x128xf32>
    %cst = arith.constant 0.904837429 : f32
    %1 = vector.broadcast %cst : f32 to vector<8x128xf32>
    %2 = arith.mulf %1, %0 : vector<8x128xf32>
    %c0_1 = arith.constant 0 : index
    %c0_2 = arith.constant 0 : index
    %3 = vector.load %arg1[%c0_1, %c0_2] : memref<8x128xf32, #tpu.memory_space<vmem>>, vector<8x128xf32>
    %cst_3 = arith.constant 0.425757259 : f32
    %4 = vector.broadcast %cst_3 : f32 to vector<8x128xf32>
    %5 = arith.mulf %4, %3 : vector<8x128xf32>
    %6 = arith.addf %2, %5 : vector<8x128xf32>
    %c0_4 = arith.constant 0 : index
    %c0_5 = arith.constant 0 : index
    %7 = vector.load %arg3[%c0_4, %c0_5] : memref<8x128xf32, #tpu.memory_space<vmem>>, vector<8x128xf32>
    tpu.vector_store %arg3[%c0_4, %c0_5], %6 {strides = array<i32>} : memref<8x128xf32, #tpu.memory_space<vmem>>, vector<8x128xf32>,
    return
  }
  func.func @transform_0(%arg0: i32) -> (i32, i32) {
    %c0_i32 = arith.constant 0 : i32
    %c0_i32_0 = arith.constant 0 : i32
    return %arg0, %c0_i32 : i32, i32
  }
  func.func @transform_1(%arg0: i32) -> (i32, i32) {
    %c0_i32 = arith.constant 0 : i32
    %c0_i32_0 = arith.constant 0 : i32
    return %arg0, %c0_i32 : i32, i32
  }
  func.func @transform_2(%arg0: i32) -> (i32, i32) {
    %c0_i32 = arith.constant 0 : i32
    %c0_i32_0 = arith.constant 0 : i32
    return %arg0, %c0_i32 : i32, i32
  }
}

</mosaic_0001>

<bundles_post_ra>
// kernel: tpu_custom_call.1
= control target key start
LH: loop header
LB: loop body
LE: loop exit
PB: predicated region body
PF: predicated region fallthrough
CT: control target
= control target key end

     0   :  { %7 = vsyncpa [#allocation3], 0  ;;  %s139_s0 = inlined_call_operand.vmem [shape: f32[8,128], index: 0, kind: input, shape index: {}]   ;;  %s140_s1 = inlined_call_operand.hbm [shape: f32[8,128], index: 1, kind: input, shape index: {}, may-alias: {1,2}]   ;;  %s141_s2 = inlined_call_operand.hbm [shape: f32[8,128], index: 2, kind: output, shape index: {}, may-alias: {1,2}]  }
   0x1   :  { %8 = vsyncpa [#allocation4], 0  ;;  %s95_s9 = smov [#allocation2]   ;;  %s47_s13 = scalar_lea.hbm %s140_s1, 128 }
   0x2   :  { %s17_s10 = sshll.u32 %s95_s9, 4  ;;  %p48_p0 = scmp.ne.s32.totalorder %s140_s1, %s47_s13  ;;  %s18_s10 = int_to_ptr.vmem [resolvable:$true] %s17_s10 }
   0x3   :  { %p51_p1 = scmp.lt.u32.totalorder %s47_s13, %s140_s1 }
   0x5   :  { %p53_p2 = pnand %p51_p1, %p48_p0 }
   0x7   :  { %56 = shalt.err (!%p53_p2)
}
   0x8   :  { %s57_s18 = scalar_lea.vmem %s18_s10, 128  ;;  %p62_p4 = scmp.lt.s32.totalorder %s18_s10, %s18_s10 }
   0x9   :  { %p58_p3 = scmp.ne.s32.totalorder %s18_s10, %s57_s18  ;;  %p63_p5 = scmp.lt.s32.totalorder %s57_s18, %s57_s18 }
   0xb   :  { %p64_p6 = por %p63_p5, %p62_p4 }
   0xd   :  { %p65_p7 = pnand %p64_p6, %p58_p3 }
   0xf   :  { %68 = shalt.err (!%p65_p7)
}
  0x10   :  { %20 = dma.hbm_to_vmem [thread:$0]  %s140_s1, 128, %s18_s10, [#allocation3]  }
  0x11   :  { %91 = dma.done.wait [#allocation3], 128  }
  0x12   :  { %92 = vsyncadd [#allocation3], 4294967168  ;;  %v24_v0 = vld [vmem:[#allocation2] sm:$0xff]  ;;  %s96_s23 = smov [#allocation5]  }
  0x13   :  { %v26_v1 = vld [vmem:[%s139_s0] sm:$0xff]  ;;  %s36_s24 = sshll.u32 %s96_s23, 4  ;;  %v25_v2 = vmul.f32 0.9048374, %v24_v0  ;;  %s37_s24 = int_to_ptr.vmem [resolvable:$true] %s36_s24 }
  0x14   :  { %v27_v3 = vmul.f32 0.42575726, %v26_v1  ;;  %s69_s25 = scalar_lea.vmem %s37_s24, 128  ;;  %p74_p9 = scmp.lt.s32.totalorder %s37_s24, %s37_s24 }
  0x15   :  { %p70_p8 = scmp.ne.s32.totalorder %s37_s24, %s69_s25  ;;  %p75_p10 = scmp.lt.s32.totalorder %s69_s25, %s69_s25 }
  0x16   :  { %v28_v4 = vadd.f32 %v27_v3, %v25_v2 }
  0x17   :  { %p76_p11 = por %p75_p10, %p74_p9 }
  0x18   :  { %29 = vst [vmem:[#allocation5] sm:$0xff] %v28_v4 }
  0x19   :  { %p77_p12 = pnand %p76_p11, %p70_p8 }
  0x1b   :  { %80 = shalt.err (!%p77_p12)
}
  0x1c   :  { %s81_s27 = scalar_lea.hbm %s141_s2, 128 }
  0x1d   :  { %p82_p13 = scmp.ne.s32.totalorder %s141_s2, %s81_s27  ;;  %p85_p0 = scmp.lt.u32.totalorder %s81_s27, %s141_s2 }
  0x1f   :  { %p87_p1 = pnand %p85_p0, %p82_p13 }
  0x21   :  { %90 = shalt.err (!%p87_p1)
}
  0x22   :  { %39 = dma.vmem_to_hbm [thread:$0]  %s37_s24, 128, %s141_s2, [#allocation4]  }
  0x23   :  { %93 = dma.done.wait [#allocation4], 128  }
  0x24   :  { %94 = vsyncadd [#allocation4], 4294967168 }
  0x25   :  { %43 = vsyncpa [#allocation3], 1 }
  0x26   :  { %44 = vsyncpa [#allocation4], 1 }

</bundles_post_ra>
